<compile_context>
chip_gen: v7x
topology: tpu7x:2x2x1
jax: 0.10.0
libtpu: 0.0.40
codegen_flags: <defaults>
</compile_context>

<pallas_src>
import jax
import jax.numpy as jnp
from jax.experimental import pallas as pl
from jax.experimental.pallas import tpu as pltpu

EPS = 1e-6  # TODO(synk): exact eps of PyRMSNormBlock's C++ impl is unknown; standard 1e-6 used.

_PER_BUFFER_CAP_BYTES = 8 * 1024 * 1024   # cap per single pipeline buffer (overhead amortized by then)
_MAX_ROW_TILE = 4096                      # absolute sanity cap on rows per grid step
_MIN_GRID_STEPS = 4                       # v7x has 2 TCs sharing HBM; give the parallel axis work to shard
_VMEM_HEADROOM_BYTES = 8 * 1024 * 1024    # slack under vmem_limit for Mosaic internal scratch


def _rmsnorm_kernel(x_ref, w_ref, o_ref):
    # x_ref: (ROW_TILE, D), w_ref: (1, D) resident f32 tile, o_ref: (ROW_TILE, D)
    xf = x_ref[...].astype(jnp.float32)
    ms = jnp.mean(xf * xf, axis=-1, keepdims=True)       # (ROW_TILE, 1), XLU reduce in f32
    inv = jax.lax.rsqrt(ms + EPS)                         # EUP
    # Re-read (cast per use) so the f32 upcast need not stay live across the
    # reduction -> scale boundary; weight is already f32 (cast hoisted to wrapper).
    o_ref[...] = (x_ref[...].astype(jnp.float32) * inv * w_ref[...]).astype(o_ref.dtype)


def _round_up(a, b):
    return ((a + b - 1) // b) * b


def _vmem_limit_bytes():
    """Chip-aware scoped-VMEM limit: ~3/4 of physical VMEM, capped at 96 MiB.

    v5e/v6e (128 MiB physical) -> 96 MiB; v7x (64 MiB physical) -> 48 MiB.
    """
    try:
        cap = int(pltpu.get_tpu_info().vmem_capacity_bytes)
    except Exception:
        cap = 128 * 1024 * 1024
    return min((cap * 3) // 4, 96 * 1024 * 1024)


def _choose_row_tile(rows, dim, itemsize, vmem_limit):
    """Largest row tile whose full working set fits the VMEM budget, with caps."""
    # Per-row-per-step working set:
    #   double-buffered input + output tiles : 4 * dim * itemsize
    #   in-kernel f32 intermediates (upcast x + pre-cast product): ~2 * dim * 4
    bytes_per_row = 4 * dim * itemsize + 8 * dim
    budget = max(vmem_limit - _VMEM_HEADROOM_BYTES, vmem_limit // 2)
    fit = max(8, budget // max(bytes_per_row, 1))
    # Bytes-based cap per individual pipeline buffer (instead of a fixed row count).
    buf_cap = max(8, _PER_BUFFER_CAP_BYTES // max(dim * itemsize, 1))
    tile = min(_MAX_ROW_TILE, fit, buf_cap, _round_up(rows, 8))
    # Keep >= _MIN_GRID_STEPS grid steps so v7x's two TensorCores both get work.
    tile = min(tile, max(8, _round_up(pl.cdiv(rows, _MIN_GRID_STEPS), 8)))
    if tile >= 16:
        tile = (tile // 16) * 16  # multiple of 16: bf16 sublane-packing friendly, also mult of 8
    else:
        tile = 8
    return tile


def rmsnorm_pallas(x, weight, chunk_size=None, row_tile=None):
    """x: (..., dim); weight: (dim,). Normalizes over the last axis."""
    del chunk_size  # only affects the C++ impl's internal chunking, not the forward math
    orig_shape = x.shape
    D = orig_shape[-1]
    rows = 1
    for s in orig_shape[:-1]:
        rows *= int(s)

    x2d = x.reshape(rows, D)
    # Hoisted cast: resident (1, D) f32 weight block, no per-step cast in the kernel.
    w2d = weight.reshape(1, D).astype(jnp.float32)

    vmem_limit = _vmem_limit_bytes()
    if row_tile is None:
        itemsize = jnp.dtype(x.dtype).itemsize
        row_tile = _choose_row_tile(rows, D, itemsize, vmem_limit)

    # No wrapper-side padding: Pallas handles the partial last block (OOB reads are
    # unspecified but stay within their own rows; OOB stores are dropped).
    grid = (pl.cdiv(rows, row_tile),)

    out2d = pl.pallas_call(
        _rmsnorm_kernel,
        out_shape=jax.ShapeDtypeStruct((rows, D), x.dtype),
        grid_spec=pl.GridSpec(
            grid=grid,
            in_specs=[
                pl.BlockSpec((row_tile, D), lambda i: (i, 0)),
                pl.BlockSpec((1, D), lambda i: (0, 0)),
            ],
            out_specs=pl.BlockSpec((row_tile, D), lambda i: (i, 0)),
        ),
        compiler_params=pltpu.CompilerParams(
            dimension_semantics=("parallel",),
            vmem_limit_bytes=vmem_limit,
        ),
    )(x2d, w2d)

    return out2d.reshape(orig_shape)


if __name__ == "__main__":
    # Deterministic small example consistent with the module:
    # dim = 128 (feature dim normalized over), chunk_size = 4 (unused in fwd),
    # input (batch=2, seq=8, dim=128).
    dim = 128
    chunk_size = 4
    key = jax.random.PRNGKey(0)
    x = jax.random.normal(key, (2, 8, dim), dtype=jnp.float32)

    # Parameter init exactly as in __init__: torch.ones(dim)
    params = jnp.ones((dim,), dtype=jnp.float32)

    out = rmsnorm_pallas(x, params, chunk_size)
    jax.block_until_ready(out)

    # sanity check vs pure-JAX reference
    ref = x * jax.lax.rsqrt(jnp.mean(x * x, axis=-1, keepdims=True) + EPS) * params
    assert jnp.allclose(out, ref, atol=1e-5, rtol=1e-5), "mismatch vs reference"

    # non-tile-divisible row count exercises the pad-less partial-block path
    x_odd = jax.random.normal(jax.random.PRNGKey(1), (3, 7, dim), dtype=jnp.float32)
    out_odd = rmsnorm_pallas(x_odd, params, chunk_size)
    jax.block_until_ready(out_odd)
    ref_odd = x_odd * jax.lax.rsqrt(jnp.mean(x_odd * x_odd, axis=-1, keepdims=True) + EPS) * params
    assert jnp.allclose(out_odd, ref_odd, atol=1e-5, rtol=1e-5), "mismatch vs reference (odd shape)"

    # bf16 input with a partial last block and non-trivial weights
    x_bf = jax.random.normal(jax.random.PRNGKey(2), (5, 9, dim), dtype=jnp.bfloat16)
    w_nt = jnp.linspace(0.5, 1.5, dim, dtype=jnp.float32)
    out_bf = rmsnorm_pallas(x_bf, w_nt, chunk_size)
    jax.block_until_ready(out_bf)
    xf = x_bf.astype(jnp.float32)
    ref_bf = (xf * jax.lax.rsqrt(jnp.mean(xf * xf, axis=-1, keepdims=True) + EPS) * w_nt).astype(jnp.bfloat16)
    assert jnp.allclose(out_bf.astype(jnp.float32), ref_bf.astype(jnp.float32),
                        atol=2e-2, rtol=2e-2), "mismatch vs reference (bf16)"

    print("KERNEL_OK")
</pallas_src>

<mosaic_0001>
module attributes {stable_mosaic.version = 11 : i64} {
  func.func @_rmsnorm_kernel(%arg0: i32, %arg1: memref<8x128xf32, #tpu.memory_space<vmem>>, %arg2: memref<1x128xf32, #tpu.memory_space<vmem>>, %arg3: memref<8x128xf32, #tpu.memory_space<vmem>>) attributes {dimension_semantics = [#tpu.dimension_semantics<parallel>], iteration_bounds = array<i64: 2>, scalar_prefetch = 0 : i64, scratch_operands = 0 : i64, tpu.core_type = #tpu.core_type<tc>, window_params = [{transform_indices = @transform_0, window_bounds = array<i64: 8, 128>}, {pipeline_mode = #tpu.pipeline_mode<synchronous>, transform_indices = @transform_1, window_bounds = array<i64: 1, 128>}, {transform_indices = @transform_2, window_bounds = array<i64: 8, 128>}]} {
    %c0 = arith.constant 0 : index
    %c0_0 = arith.constant 0 : index
    %0 = vector.load %arg1[%c0, %c0_0] : memref<8x128xf32, #tpu.memory_space<vmem>>, vector<8x128xf32>
    %1 = arith.mulf %0, %0 : vector<8x128xf32>
    %cst = arith.constant dense<0.000000e+00> : vector<8xf32>
    %2 = vector.multi_reduction <add>, %1, %cst [1] : vector<8x128xf32> to vector<8xf32>
    %3 = vector.shape_cast %2 : vector<8xf32> to vector<8x1xf32>
    %cst_1 = arith.constant 1.280000e+02 : f32
    %4 = vector.broadcast %cst_1 : f32 to vector<8x1xf32>
    %5 = arith.divf %3, %4 : vector<8x1xf32>
    %cst_2 = arith.constant 9.99999997E-7 : f32
    %6 = vector.broadcast %cst_2 : f32 to vector<8x1xf32>
    %7 = arith.addf %5, %6 : vector<8x1xf32>
    %8 = math.rsqrt %7 : vector<8x1xf32>
    %c0_3 = arith.constant 0 : index
    %c0_4 = arith.constant 0 : index
    %9 = vector.load %arg1[%c0_3, %c0_4] : memref<8x128xf32, #tpu.memory_space<vmem>>, vector<8x128xf32>
    %10 = vector.broadcast %8 : vector<8x1xf32> to vector<8x128xf32>
    %11 = arith.mulf %9, %10 : vector<8x128xf32>
    %c0_5 = arith.constant 0 : index
    %c0_6 = arith.constant 0 : index
    %12 = vector.load %arg2[%c0_5, %c0_6] : memref<1x128xf32, #tpu.memory_space<vmem>>, vector<1x128xf32>
    %13 = vector.broadcast %12 : vector<1x128xf32> to vector<8x128xf32>
    %14 = arith.mulf %11, %13 : vector<8x128xf32>
    %c0_7 = arith.constant 0 : index
    %c0_8 = arith.constant 0 : index
    %15 = vector.load %arg3[%c0_7, %c0_8] : memref<8x128xf32, #tpu.memory_space<vmem>>, vector<8x128xf32>
    tpu.vector_store %arg3[%c0_7, %c0_8], %14 {strides = array<i32>} : memref<8x128xf32, #tpu.memory_space<vmem>>, vector<8x128xf32>,
    return
  }
  func.func @transform_0(%arg0: i32) -> (i32, i32) {
    %c0_i32 = arith.constant 0 : i32
    %c0_i32_0 = arith.constant 0 : i32
    return %arg0, %c0_i32 : i32, i32
  }
  func.func @transform_1(%arg0: i32) -> (i32, i32) {
    %c0_i32 = arith.constant 0 : i32
    %c0_i32_0 = arith.constant 0 : i32
    %c0_i32_1 = arith.constant 0 : i32
    return %c0_i32, %c0_i32_0 : i32, i32
  }
  func.func @transform_2(%arg0: i32) -> (i32, i32) {
    %c0_i32 = arith.constant 0 : i32
    %c0_i32_0 = arith.constant 0 : i32
    return %arg0, %c0_i32 : i32, i32
  }
}

</mosaic_0001>

<bundles_post_ra>
// kernel: tpu_custom_call.1
= control target key start
LH: loop header
LB: loop body
LE: loop exit
PB: predicated region body
PF: predicated region fallthrough
CT: control target
= control target key end

     0   :  { %7 = vsyncpa [#allocation3], 0  ;;  %s707_s0 = inlined_call_operand.hbm [shape: f32[16,128], index: 0, kind: input, shape index: {}]   ;;  %s708_s1 = inlined_call_operand.hbm [shape: f32[1,128], index: 1, kind: input, shape index: {}]   ;;  %s709_s2 = inlined_call_operand.hbm [shape: f32[16,128], index: 2, kind: output, shape index: {}]  }
   0x1   :  { %9 = vsyncpa [#allocation3 + $0x1], 0 }
   0x2   :  { %10 = vsyncpa [#allocation6], 0 }
   0x3   :  { %11 = vsyncpa [#allocation4], 0 }
   0x4   :  { %13 = vsyncpa [#allocation4 + $0x1], 0  ;;  %s506_s9 = smov 0   ;;  %s508_s10 = smov 0  }
   0x5   :  { %s510_s11 = smov 0   ;;  %s512_s12 = smov 0  }
   0x6 LB: > { %s527_s13 = sadd.s32 4294967295, %s486_s12   ;;  %s284_s14 = sadd.s32 4294967294, %s486_s12   ;;  %s486_s12 = sphi %s512_s12, %s733_s12   ;;  %s482_s11 = sphi %s510_s11, %s732_s11   ;;  %s478_s10 = sphi %s508_s10, %s731_s10   ;;  %s474_s9 = sphi %s506_s9, %s730_s9  }
   0x7   : > { %p39_p0 = scmp.ne.s32.totalorder %s478_s10, %s474_s9  ;;  %p710_p1 = scmp.eq.s32.totalorder %s527_s13, 0 }
   0x8   : > { %p90_p3 = scmp.eq.s32.totalorder %s284_s14, 1  ;;  %p285_p5 = scmp.ge.s32.totalorder %s486_s12, 1 }
   0x9   : > { %p536_p4 = por %p710_p1, %p39_p0  ;;  %p97_p7 = scmp.lt.s32.totalorder %s486_s12, 3 }
   0xa   : > { %p541_p6 = por %p90_p3, %p39_p0  ;;  %s488_s18 = smov [#allocation5]  }
   0xb   : > { %s713_s15 = scalar_select %p536_p4, 1, 0 }
   0xc   : > { %s714_s16 = scalar_select %p541_p6, 1, 0 }
   0xd   : > { %p546_p8 = pnand %p285_p5, %p97_p7  ;;  %s110_s19 = sshll.u32 %s488_s18, 4  ;;  %s111_s19 = int_to_ptr.vmem [resolvable:$true] %s110_s19 }
   0xe   : > { %s554_s20 = sadd.s32 1, %s486_s12   ;;  %s26_s24 = sadd.s32 1, %s482_s11 }
   0xf   : > { %s715_s17 = scalar_select %p546_p8, 1, 0 }
  0x10   : > { %p307_p10 = pneg %p546_p8  ;;  %s23_s22 = ssub.s32 %s486_s12, %s554_s20 }
  0x11   : > { %p564_p12 = scmp.eq.s32.totalorder %s23_s22, 0  ;;  %s358_s27 = scalar_lea.hbm %s708_s1, 16 }
  0x12   : > { %p558_p11 = pnand %p307_p10, %p710_p1  ;;  %p359_p0 = scmp.ne.s32.totalorder %s708_s1, %s358_s27 }
  0x13   : > { %s717_s23 = scalar_select %p564_p12, 1, 0 }
  0x14   : > { %p360_p3 = pneg %p558_p11  ;;  %p365_p10 = scmp.lt.u32.totalorder %s358_s27, %s708_s1 }
  0x16   : > { %p361_p5 = pnand %p360_p3, %p359_p0 }
  0x18   : > { %p362_p7 = pneg %p361_p5 }
  0x1a   : > { %p367_p9 = pnand %p365_p10, %p362_p7 }
  0x1c   : > { %370 = shalt.err (!%p367_p9)
}
  0x1d   : > { %s371_s4 = scalar_lea.vmem %s111_s19, 16  ;;  %s378_s5 = scalar_lea.vmem %s111_s19, 32 }
  0x1e   : > { %p372_p1 = scmp.ne.s32.totalorder %s111_s19, %s371_s4  ;;  %p379_p6 = scmp.lt.s32.totalorder %s111_s19, %s111_s19 }
  0x1f   : > { %p380_p4 = scmp.lt.s32.totalorder %s378_s5, %s371_s4 }
  0x20   : > { %p374_p2 = pnand %p372_p1, %p360_p3 }
  0x21   : > { %p381_p8 = por %p380_p4, %p379_p6 }
  0x22   : > { %p375_p13 = pneg %p374_p2 }
  0x24   : > { %p382_p12 = pnand %p381_p8, %p375_p13 }
  0x26   : > { %385 = shalt.err (!%p382_p12)
}
  0x27   : > { %310 = dma.hbm_to_vmem [thread:$0]  (!%p558_p11), %s708_s1, 16, %s111_s19, [#allocation6]  }
  0x28   : > { %p718_p1 = scmp.ne.s32.totalorder %s717_s23, 0  ;;  %p34_p2 = scmp.eq.s32.totalorder %s486_s12, 0 }
  0x29   : > { %p719_p4 = scmp.ne.s32.totalorder %s482_s11, %s478_s10  ;;  %p720_p6 = scmp.eq.s32.totalorder %s527_s13, 1 }
  0x2a   : > { %s590_s8 = scalar_select %p718_p1, %s482_s11, %s26_s24  }
  0x2b   : > { %p598_p8 = por %p720_p6, %p719_p4  ;;  %p320_p9 = scmp.lt.s32.totalorder %s486_s12, 2 }
  0x2c   : > { %s121_s18 = sand.u32 1, %s482_s11   ;;  %p722_p12 = pmov %p719_p4 }
  0x2d   : > { %s288_s21 = sshll.u32 %s121_s18, 3  ;;  %s289_s22 = sshll.u32 %s486_s12, 7 }
  0x2e   : > { %p35_p13 = por %p34_p2, %p722_p12  ;;  %s611_s19 = scalar_lea.hbm %s707_s0, %s289_s22 }
  0x2f   : > { %s125_s23 = scalar_lea.vmem [#allocation2], %s288_s21  ;;  %s122_s28 = scalar_lea.sflag [#allocation3], %s121_s18 }
  0x30   : > { %s132_s24 = sshll.u32 %s125_s23, 4  ;;  %p613_p11 = pnand %p320_p9, %p35_p13  ;;  %s617_s24 = int_to_ptr.vmem [resolvable:$true] %s132_s24 }
  0x31   : > { %s386_s29 = scalar_lea.hbm %s611_s19, 128  ;;  %s391_s4 = scalar_lea.hbm %s707_s0, 256 }
  0x32   : > { %p387_p0 = scmp.ne.s32.totalorder %s611_s19, %s386_s29  ;;  %p388_p3 = pneg %p613_p11 }
  0x33   : > { %p392_p10 = scmp.lt.u32.totalorder %s611_s19, %s707_s0  ;;  %p393_p1 = scmp.lt.u32.totalorder %s391_s4, %s386_s29 }
  0x34   : > { %p389_p5 = pnand %p388_p3, %p387_p0  ;;  %p395_p4 = scmp.lt.u32.totalorder %s386_s29, %s611_s19 }
  0x35   : > { %p394_p2 = por %p393_p1, %p392_p10 }
  0x36   : > { %p390_p7 = pneg %p389_p5 }
  0x37   : > { %p396_p6 = por %p395_p4, %p394_p2 }
  0x39   : > { %p397_p9 = pnand %p396_p6, %p390_p7 }
  0x3b   : > { %400 = shalt.err (!%p397_p9)
}
  0x3c   : > { %s401_s7 = scalar_lea.vmem %s617_s24, 128  ;;  %s489_s18 = smov [#allocation2]  }
  0x3d   : > { %p402_p12 = scmp.ne.s32.totalorder %s617_s24, %s401_s7  ;;  %s406_s21 = sshll.u32 %s489_s18, 4  ;;  %s407_s21 = int_to_ptr.vmem [resolvable:$false] %s406_s21 }
  0x3e   : > { %s408_s22 = scalar_lea.vmem %s407_s21, 256  ;;  %p409_p5 = scmp.lt.s32.totalorder %s617_s24, %s407_s21 }
  0x3f   : > { %p404_p13 = pnand %p402_p12, %p388_p3  ;;  %p410_p10 = scmp.lt.s32.totalorder %s408_s22, %s401_s7 }
  0x41   : > { %p405_p0 = pneg %p404_p13  ;;  %p411_p1 = por %p410_p10, %p409_p5 }
  0x43   : > { %p412_p2 = pnand %p411_p1, %p405_p0 }
  0x45   : > { %415 = shalt.err (!%p412_p2)
}
  0x46   : > { %314 = dma.hbm_to_vmem [thread:$0]  (!%p613_p11), %s611_s19, 128, %s617_s24, %s122_s28  }
  0x47   : > { %p724_p7 = scmp.ne.s32.totalorder %s715_s17, 0 }
  0x48   : > { %s647_s25 = sand.u32 (!%p724_p7), 1, %s478_s10   ;;  %p725_p3 = scmp.ne.s32.totalorder (!%p724_p7), %s713_s15, 0 }
  0x49   : > { %141 = sbr.rel (%p724_p7) target bundleno = 262 (0x106), region = 28  ;;  %s291_s26 = sshll.u32 (!%p724_p7), %s647_s25, 3 }
  0x4a   : > { %s144_s23 = scalar_lea.sflag (!%p724_p7), [#allocation3], %s647_s25  ;;  %s147_s29 = scalar_lea.vmem (!%p724_p7), [#allocation2], %s291_s26 }
  0x50   : > { %461 = dma.done.wait (%p725_p3), %s144_s23, 128  }
  0x51   : > { %463 = vsyncadd (%p725_p3), %s144_s23, 4294967168  ;;  %p726_p4 = scmp.eq.s32.totalorder %s527_s13, 0 }
  0x53   : > { %465 = dma.done.wait (%p726_p4), [#allocation6], 16   ;;  %p727_p11 = pmov %p726_p4 }
  0x54   : > { %v172_v0 = vld [vmem:[%s147_s29] sm:$0xff]  ;;  %v294_v6 = vld [vmem:[#allocation5] ss:$0 sm:$0xff]  ;;  %s296_s15 = sshll.u32 %s527_s13, 7  ;;  %s171_s17 = scalar_lea.vmem [#allocation7], %s291_s26 }
  0x55   : > { %467 = vsyncadd (%p727_p11), [#allocation6], 4294967280  ;;  %v173_v1 = vmul.f32 %v172_v0, %v172_v0  ;;  %s204_s19 = sshll.u32 %s171_s17, 4  ;;  %s663_s28 = scalar_lea.hbm %s709_s2, %s296_s15  ;;  %s665_s19 = int_to_ptr.vmem [resolvable:$true] %s204_s19 }
  0x56   : > { %s191_s30 = scalar_lea.sflag [#allocation4], %s647_s25  ;;  %s416_s3 = scalar_lea.vmem %s665_s19, 128 }
  0x57   : > { %174 = vadd.xlane.f32.xlu0 %v173_v1  ;;  %p417_p6 = scmp.ne.s32.totalorder %s665_s19, %s416_s3  ;;  %s490_s13 = smov [#allocation7]  }
  0x58   : > { %s420_s4 = sshll.u32 %s490_s13, 4  ;;  %s421_s4 = int_to_ptr.vmem [resolvable:$false] %s420_s4 }
  0x59   : > { %p418_p9 = pnand %p417_p6, %p598_p8  ;;  %s422_s5 = scalar_lea.vmem %s421_s4, 256 }
  0x5a   : > { %p423_p13 = scmp.lt.s32.totalorder %s665_s19, %s421_s4  ;;  %p424_p0 = scmp.lt.s32.totalorder %s422_s5, %s416_s3 }
  0x5b   : > { %p419_p12 = pneg %p418_p9 }
  0x5c   : > { %p425_p5 = por %p424_p0, %p423_p13 }
  0x5e   : > { %p426_p10 = pnand %p425_p5, %p419_p12 }
  0xe4   : > { %v175_v2 = vpop.xlane.xlu0 %174 }
  0xe5   : > { %v177_v3 = vmul.f32 0.0078125, %v175_v2 }
  0xe7   : > { %v178_v4 = vadd.f32 1e-06, %v177_v3 }
  0xe9   : > { %356 = vrsqrt.f32 %v178_v4 }
  0xf3   : > { %v357_v5 = vpop.eup %356 }
  0xf4   : > { %v180_v7 = vmul.f32 %v357_v5, %v172_v0 }
  0xf6   : > { %v188_v8 = vmul.f32 %v294_v6, %v180_v7 }
  0xf8   : > { %189 = vst [vmem:[%s171_s17] sm:$0xff] %v188_v8 }
  0xf9   : > { %429 = shalt.err (!%p426_p10)
}
  0xfa   : > { %s430_s6 = scalar_lea.hbm %s663_s28, 128  ;;  %s434_s21 = scalar_lea.hbm %s709_s2, 256 }
  0xfb   : > { %p431_p1 = scmp.ne.s32.totalorder %s663_s28, %s430_s6  ;;  %p435_p3 = scmp.lt.u32.totalorder %s663_s28, %s709_s2 }
  0xfc   : > { %p436_p4 = scmp.lt.u32.totalorder %s434_s21, %s430_s6  ;;  %p438_p6 = scmp.lt.u32.totalorder %s430_s6, %s663_s28 }
  0xfd   : > { %p432_p2 = pnand %p431_p1, %p598_p8 }
  0xfe   : > { %p437_p11 = por %p436_p4, %p435_p3 }
  0xff   : > { %p433_p7 = pneg %p432_p2 }
 0x100   : > { %p439_p9 = por %p438_p6, %p437_p11 }
 0x102   : > { %p440_p12 = pnand %p439_p9, %p433_p7 }
 0x104   : > { %443 = shalt.err (!%p440_p12)
}
 0x105   : > { %305 = dma.vmem_to_hbm [thread:$0]  (%p598_p8), %s665_s19, 128, %s663_s28, %s191_s30  }
 0x106 PF: > { %s216_s26 = sand.u32 1, %s474_s9   ;;  %p728_p13 = scmp.ne.s32.totalorder %s714_s16, 0 }
 0x107   : > { %p729_p0 = scmp.ge.s32.totalorder %s486_s12, 2  ;;  %s217_s23 = scalar_lea.sflag [#allocation4], %s216_s26 }
 0x109   : > { %p316_p5 = pnand %p729_p0, %p728_p13 }
 0x10b   : > { %469 = dma.done.wait (!%p316_p5), %s217_s23, 128  }
 0x10c   : > { %471 = vsyncadd (!%p316_p5), %s217_s23, 4294967168  ;;  %p16_p10 = scmp.ge.s32.totalorder %s554_s20, 4   ;;  %s730_s9 = smov %s478_s10 }
 0x10d   : > { %s731_s10 = smov %s482_s11  ;;  %s732_s11 = smov %s590_s8 }
 0x10e   : > { %s733_s12 = smov %s554_s20  ;;  %18 = sbr.rel (!%p16_p10) target bundleno = 6 (0x6), region = 77 }
 0x115   :  { %222 = vsyncpa [#allocation3], 1 }
 0x116   :  { %224 = vsyncpa [#allocation3 + $0x1], 1 }
 0x117   :  { %225 = vsyncpa [#allocation6], 1 }
 0x118   :  { %226 = vsyncpa [#allocation4], 1 }
 0x119   :  { %228 = vsyncpa [#allocation4 + $0x1], 1 }

</bundles_post_ra>
